<compile_context>
chip_gen: v6e
topology: v6e:2x2x1
jax: 0.10.0
libtpu: 0.0.40
codegen_flags: <defaults>
</compile_context>

<pallas_src>
import jax
import jax.numpy as jnp
from jax.experimental import pallas as pl
from jax.experimental.pallas import tpu as pltpu

hidden_size = 128
input_size = 28
output_size = 10


def rnn_kernel(x_ref, w_ih_ref, w_hh_ref, b_ref, w_fc_ref, b_fc_ref, out_ref):
    """Full RNN unroll + final linear layer, all operands resident in VMEM.

    x_ref:    (T*B_pad, D_pad)  time-major, batch-padded, flattened input
    w_ih_ref: (D_pad, H)        input->hidden weight (transposed, row-padded)
    w_hh_ref: (H, H)            hidden->hidden weight (transposed)
    b_ref:    (1, H)            b_ih + b_hh fused
    w_fc_ref: (H, O_pad)        fc weight (transposed, lane-padded to 128)
    b_fc_ref: (1, O_pad)        fc bias (lane-padded)
    out_ref:  (B_pad, O_pad)    lane-dense output (wrapper slices to (B, O))
    """
    B_pad = out_ref.shape[0]
    T = x_ref.shape[0] // B_pad

    # Hoisted input projection: one MXU matmul for every timestep at once,
    # fused bias added a single time (off the recurrent critical path).
    x_proj = (jnp.dot(x_ref[...], w_ih_ref[...],
                      preferred_element_type=jnp.float32)
              + b_ref[...])                                   # (T*B_pad, H)

    w_hh = w_hh_ref[...]                                      # load once

    # Recurrence: only h @ W_hh + tanh on the serial path; h stays in vregs.
    h = jnp.zeros((B_pad, w_hh.shape[0]), jnp.float32)
    for t in range(T):                                        # static unroll
        x_t = x_proj[t * B_pad:(t + 1) * B_pad, :]            # static slice
        h = jnp.tanh(x_t + jnp.dot(h, w_hh,
                                   preferred_element_type=jnp.float32))

    # Final fc into a 128-lane-padded buffer -> unmasked stores.
    out_ref[...] = (jnp.dot(h, w_fc_ref[...],
                            preferred_element_type=jnp.float32)
                    + b_fc_ref[...])


def _round_up(n, m):
    return ((n + m - 1) // m) * m


@jax.jit
def rnn_forward(x_btd, w_ih, w_hh, b_ih, b_hh, w_fc, b_fc):
    """x_btd: (B, T, D_in) batch-first, like the PyTorch module."""
    B, T, D = x_btd.shape
    H = w_ih.shape[0]          # PyTorch W_ih: (H, D_in)
    O = w_fc.shape[0]          # PyTorch W_fc: (O, H)

    B_pad = _round_up(max(B, 8), 8)        # sublane granule
    D_pad = _round_up(D, 8)                # 28 -> 32 (sublane-aligned W_ih)
    O_pad = _round_up(max(O, 128), 128)    # lane-dense output

    # Glue: time-major, pad batch/feature dims, flatten to one matmul slab.
    x_tbd = jnp.transpose(x_btd, (1, 0, 2)).astype(jnp.float32)     # (T, B, D)
    x_tbd = jnp.pad(x_tbd, ((0, 0), (0, B_pad - B), (0, D_pad - D)))
    x_flat = x_tbd.reshape(T * B_pad, D_pad)                        # (T*Bp, Dp)

    w_ih_t = jnp.pad(jnp.transpose(w_ih).astype(jnp.float32),
                     ((0, D_pad - D), (0, 0)))                      # (Dp, H)
    w_hh_t = jnp.transpose(w_hh).astype(jnp.float32)                # (H, H)
    b = (b_ih + b_hh).reshape(1, H).astype(jnp.float32)             # (1, H)
    w_fc_t = jnp.pad(jnp.transpose(w_fc).astype(jnp.float32),
                     ((0, 0), (0, O_pad - O)))                      # (H, Op)
    b_fc_r = jnp.pad(b_fc.reshape(1, O).astype(jnp.float32),
                     ((0, 0), (0, O_pad - O)))                      # (1, Op)

    vmem = pl.BlockSpec(memory_space=pltpu.MemorySpace.VMEM)
    out_pad = pl.pallas_call(
        rnn_kernel,
        out_shape=jax.ShapeDtypeStruct((B_pad, O_pad), jnp.float32),
        in_specs=[vmem] * 6,
        out_specs=vmem,
    )(x_flat, w_ih_t, w_hh_t, b, w_fc_t, b_fc_r)

    return out_pad[:B, :O]


def rnn_reference(x_btd, w_ih, w_hh, b_ih, b_hh, w_fc, b_fc):
    """Pure-JAX reference matching PyTorch nn.RNN + Linear."""
    B, T, D = x_btd.shape
    H = w_ih.shape[0]
    h = jnp.zeros((B, H), jnp.float32)
    for t in range(T):
        h = jnp.tanh(x_btd[:, t, :] @ w_ih.T + b_ih + h @ w_hh.T + b_hh)
    return h @ w_fc.T + b_fc


if __name__ == "__main__":
    B, T = 2, 8
    key = jax.random.PRNGKey(0)
    kx, k1, k2, k3, k4, k5, k6 = jax.random.split(key, 7)

    # deterministic PyTorch-style init: U(-1/sqrt(H), 1/sqrt(H))
    bound = 1.0 / jnp.sqrt(jnp.float32(hidden_size))
    w_ih = jax.random.uniform(k1, (hidden_size, input_size), jnp.float32, -bound, bound)
    w_hh = jax.random.uniform(k2, (hidden_size, hidden_size), jnp.float32, -bound, bound)
    b_ih = jax.random.uniform(k3, (hidden_size,), jnp.float32, -bound, bound)
    b_hh = jax.random.uniform(k4, (hidden_size,), jnp.float32, -bound, bound)
    w_fc = jax.random.uniform(k5, (output_size, hidden_size), jnp.float32, -bound, bound)
    b_fc = jax.random.uniform(k6, (output_size,), jnp.float32, -bound, bound)

    x = jax.random.normal(kx, (B, T, input_size), jnp.float32)

    out = rnn_forward(x, w_ih, w_hh, b_ih, b_hh, w_fc, b_fc)
    out = jax.block_until_ready(out)

    ref = rnn_reference(x, w_ih, w_hh, b_ih, b_hh, w_fc, b_fc)
    assert out.shape == (B, output_size)
    assert jnp.allclose(out, ref, atol=1e-4, rtol=1e-4), "mismatch vs reference"

    print("KERNEL_OK")
</pallas_src>

<mosaic_0001>
module attributes {stable_mosaic.version = 11 : i64} {
  func.func @rnn_kernel(%arg0: memref<64x32xf32, #tpu.memory_space<vmem>>, %arg1: memref<32x128xf32, #tpu.memory_space<vmem>>, %arg2: memref<128x128xf32, #tpu.memory_space<vmem>>, %arg3: memref<1x128xf32, #tpu.memory_space<vmem>>, %arg4: memref<128x128xf32, #tpu.memory_space<vmem>>, %arg5: memref<1x128xf32, #tpu.memory_space<vmem>>, %arg6: memref<8x128xf32, #tpu.memory_space<vmem>>) attributes {dimension_semantics = [], scalar_prefetch = 0 : i64, scratch_operands = 0 : i64, tpu.core_type = #tpu.core_type<tc>} {
    %c0 = arith.constant 0 : index
    %c0_0 = arith.constant 0 : index
    %0 = vector.load %arg0[%c0, %c0_0] : memref<64x32xf32, #tpu.memory_space<vmem>>, vector<64x32xf32>
    %c0_1 = arith.constant 0 : index
    %c0_2 = arith.constant 0 : index
    %1 = vector.load %arg1[%c0_1, %c0_2] : memref<32x128xf32, #tpu.memory_space<vmem>>, vector<32x128xf32>
    %cst = arith.constant dense<0.000000e+00> : vector<64x128xf32>
    %2 = tpu.matmul %0, %1, %cst {dimension_numbers = #tpu.dot_dimension_numbers<[1], [0], [0], [1], [0, 0, 1, 1], [], []>} : vector<64x32xf32>, vector<32x128xf32>, vector<64x128xf32> -> vector<64x128xf32>
    %c0_3 = arith.constant 0 : index
    %c0_4 = arith.constant 0 : index
    %3 = vector.load %arg3[%c0_3, %c0_4] : memref<1x128xf32, #tpu.memory_space<vmem>>, vector<1x128xf32>
    %4 = vector.broadcast %3 : vector<1x128xf32> to vector<64x128xf32>
    %5 = arith.addf %2, %4 : vector<64x128xf32>
    %c0_5 = arith.constant 0 : index
    %c0_6 = arith.constant 0 : index
    %6 = vector.load %arg2[%c0_5, %c0_6] : memref<128x128xf32, #tpu.memory_space<vmem>>, vector<128x128xf32>
    %cst_7 = arith.constant 0.000000e+00 : f32
    %7 = vector.broadcast %cst_7 : f32 to vector<8x128xf32>
    %8 = vector.extract_strided_slice %5 {offsets = [0, 0], sizes = [8, 128], strides = [1, 1]} : vector<64x128xf32> to vector<8x128xf32>
    %cst_8 = arith.constant dense<0.000000e+00> : vector<8x128xf32>
    %9 = tpu.matmul %7, %6, %cst_8 {dimension_numbers = #tpu.dot_dimension_numbers<[1], [0], [0], [1], [0, 0, 1, 1], [], []>} : vector<8x128xf32>, vector<128x128xf32>, vector<8x128xf32> -> vector<8x128xf32>
    %10 = arith.addf %8, %9 : vector<8x128xf32>
    %11 = math.tanh %10 : vector<8x128xf32>
    %12 = vector.extract_strided_slice %5 {offsets = [8, 0], sizes = [8, 128], strides = [1, 1]} : vector<64x128xf32> to vector<8x128xf32>
    %cst_9 = arith.constant dense<0.000000e+00> : vector<8x128xf32>
    %13 = tpu.matmul %11, %6, %cst_9 {dimension_numbers = #tpu.dot_dimension_numbers<[1], [0], [0], [1], [0, 0, 1, 1], [], []>} : vector<8x128xf32>, vector<128x128xf32>, vector<8x128xf32> -> vector<8x128xf32>
    %14 = arith.addf %12, %13 : vector<8x128xf32>
    %15 = math.tanh %14 : vector<8x128xf32>
    %16 = vector.extract_strided_slice %5 {offsets = [16, 0], sizes = [8, 128], strides = [1, 1]} : vector<64x128xf32> to vector<8x128xf32>
    %cst_10 = arith.constant dense<0.000000e+00> : vector<8x128xf32>
    %17 = tpu.matmul %15, %6, %cst_10 {dimension_numbers = #tpu.dot_dimension_numbers<[1], [0], [0], [1], [0, 0, 1, 1], [], []>} : vector<8x128xf32>, vector<128x128xf32>, vector<8x128xf32> -> vector<8x128xf32>
    %18 = arith.addf %16, %17 : vector<8x128xf32>
    %19 = math.tanh %18 : vector<8x128xf32>
    %20 = vector.extract_strided_slice %5 {offsets = [24, 0], sizes = [8, 128], strides = [1, 1]} : vector<64x128xf32> to vector<8x128xf32>
    %cst_11 = arith.constant dense<0.000000e+00> : vector<8x128xf32>
    %21 = tpu.matmul %19, %6, %cst_11 {dimension_numbers = #tpu.dot_dimension_numbers<[1], [0], [0], [1], [0, 0, 1, 1], [], []>} : vector<8x128xf32>, vector<128x128xf32>, vector<8x128xf32> -> vector<8x128xf32>
    %22 = arith.addf %20, %21 : vector<8x128xf32>
    %23 = math.tanh %22 : vector<8x128xf32>
    %24 = vector.extract_strided_slice %5 {offsets = [32, 0], sizes = [8, 128], strides = [1, 1]} : vector<64x128xf32> to vector<8x128xf32>
    %cst_12 = arith.constant dense<0.000000e+00> : vector<8x128xf32>
    %25 = tpu.matmul %23, %6, %cst_12 {dimension_numbers = #tpu.dot_dimension_numbers<[1], [0], [0], [1], [0, 0, 1, 1], [], []>} : vector<8x128xf32>, vector<128x128xf32>, vector<8x128xf32> -> vector<8x128xf32>
    %26 = arith.addf %24, %25 : vector<8x128xf32>
    %27 = math.tanh %26 : vector<8x128xf32>
    %28 = vector.extract_strided_slice %5 {offsets = [40, 0], sizes = [8, 128], strides = [1, 1]} : vector<64x128xf32> to vector<8x128xf32>
    %cst_13 = arith.constant dense<0.000000e+00> : vector<8x128xf32>
    %29 = tpu.matmul %27, %6, %cst_13 {dimension_numbers = #tpu.dot_dimension_numbers<[1], [0], [0], [1], [0, 0, 1, 1], [], []>} : vector<8x128xf32>, vector<128x128xf32>, vector<8x128xf32> -> vector<8x128xf32>
    %30 = arith.addf %28, %29 : vector<8x128xf32>
    %31 = math.tanh %30 : vector<8x128xf32>
    %32 = vector.extract_strided_slice %5 {offsets = [48, 0], sizes = [8, 128], strides = [1, 1]} : vector<64x128xf32> to vector<8x128xf32>
    %cst_14 = arith.constant dense<0.000000e+00> : vector<8x128xf32>
    %33 = tpu.matmul %31, %6, %cst_14 {dimension_numbers = #tpu.dot_dimension_numbers<[1], [0], [0], [1], [0, 0, 1, 1], [], []>} : vector<8x128xf32>, vector<128x128xf32>, vector<8x128xf32> -> vector<8x128xf32>
    %34 = arith.addf %32, %33 : vector<8x128xf32>
    %35 = math.tanh %34 : vector<8x128xf32>
    %36 = vector.extract_strided_slice %5 {offsets = [56, 0], sizes = [8, 128], strides = [1, 1]} : vector<64x128xf32> to vector<8x128xf32>
    %cst_15 = arith.constant dense<0.000000e+00> : vector<8x128xf32>
    %37 = tpu.matmul %35, %6, %cst_15 {dimension_numbers = #tpu.dot_dimension_numbers<[1], [0], [0], [1], [0, 0, 1, 1], [], []>} : vector<8x128xf32>, vector<128x128xf32>, vector<8x128xf32> -> vector<8x128xf32>
    %38 = arith.addf %36, %37 : vector<8x128xf32>
    %39 = math.tanh %38 : vector<8x128xf32>
    %c0_16 = arith.constant 0 : index
    %c0_17 = arith.constant 0 : index
    %40 = vector.load %arg4[%c0_16, %c0_17] : memref<128x128xf32, #tpu.memory_space<vmem>>, vector<128x128xf32>
    %cst_18 = arith.constant dense<0.000000e+00> : vector<8x128xf32>
    %41 = tpu.matmul %39, %40, %cst_18 {dimension_numbers = #tpu.dot_dimension_numbers<[1], [0], [0], [1], [0, 0, 1, 1], [], []>} : vector<8x128xf32>, vector<128x128xf32>, vector<8x128xf32> -> vector<8x128xf32>
    %c0_19 = arith.constant 0 : index
    %c0_20 = arith.constant 0 : index
    %42 = vector.load %arg5[%c0_19, %c0_20] : memref<1x128xf32, #tpu.memory_space<vmem>>, vector<1x128xf32>
    %43 = vector.broadcast %42 : vector<1x128xf32> to vector<8x128xf32>
    %44 = arith.addf %41, %43 : vector<8x128xf32>
    %c0_21 = arith.constant 0 : index
    %c0_22 = arith.constant 0 : index
    %45 = vector.load %arg6[%c0_21, %c0_22] : memref<8x128xf32, #tpu.memory_space<vmem>>, vector<8x128xf32>
    tpu.vector_store %arg6[%c0_21, %c0_22], %44 {strides = array<i32>} : memref<8x128xf32, #tpu.memory_space<vmem>>, vector<8x128xf32>,
    return
  }
}

</mosaic_0001>

<bundles_post_ra>
// kernel: rnn_forward.1
= control target key start
LH: loop header
LB: loop body
LE: loop exit
PB: predicated region body
PF: predicated region fallthrough
CT: control target
= control target key end

     0   :  { %v1390_v0 = vmov 0.0   ;;  %vm1391_vm0 = vmmov 0   ;;  %vm42_vm1 = vcmask 261120   ;;  %s1924_s2 = inlined_call_operand.vmem [shape: f32[128,128], index: 2, kind: input, shape index: {}]   ;;  %s1925_s1 = inlined_call_operand.vmem [shape: f32[32,128], index: 1, kind: input, shape index: {}]   ;;  %s1926_s0 = inlined_call_operand.vmem [shape: f32[64,32], index: 0, kind: input, shape index: {}]   ;;  %s1927_s3 = inlined_call_operand.vmem [shape: f32[1,128], index: 3, kind: input, shape index: {}]   ;;  %s1928_s4 = inlined_call_operand.vmem [shape: f32[128,128], index: 4, kind: input, shape index: {}]   ;;  %s1929_s5 = inlined_call_operand.vmem [shape: f32[1,128], index: 5, kind: input, shape index: {}]   ;;  %s1930_s6 = inlined_call_operand.vmem [shape: f32[8,128], index: 6, kind: output, shape index: {}]  }
   0x1   :  { %1057 = vmatprep.subr.mxu1 %v1390_v0  ;;  %v1431_v1 = vld [vmem:[%s1924_s2 + $0x78] sm:$0xff]  ;;  %v1436_v2 = vld [vmem:[%s1924_s2 + $0x70] sm:$0xff]  ;;  %1089 = vmatprep.mubr.msk.f32.mxu1 %vm1391_vm0, %v1390_v0  ;;  %v1445_v3 = vld [vmem:[%s1924_s2 + $0x68] sm:$0xff] }
   0x2   :  { %1058 = vmatpush3.msra.mxu1 %v1431_v1  ;;  %v34_v4 = vld [vmem:[%s1925_s1 + $0x18] sm:$0xff]  ;;  %v33_v5 = vld [vmem:[%s1925_s1 + $0x10] sm:$0xff]  ;;  %v1458_v6 = vld [vmem:[%s1924_s2 + $0x60] sm:$0xff] }
   0x3   :  { %1059 = vmatprep.subr.mxu1 %v1390_v0  ;;  %1037 = vmatprep.subr.mxu0 %v34_v4  ;;  %v32_v7 = vld [vmem:[%s1925_s1 + $0x8] sm:$0xff]  ;;  %v1468_v8 = vld [vmem:[%s1924_s2 + $0x58] sm:$0xff]  ;;  %v31_v9 = vld [vmem:[%s1925_s1] sm:$0xff] }
   0x4   :  { %1060 = vmatpush3.msra.mxu1 %v1436_v2  ;;  %1038 = vmatpush3.msra.mxu0 %v34_v4  ;;  %v1478_v10 = vld [vmem:[%s1924_s2 + $0x50] sm:$0xff]  ;;  %v23_v11 = vld [vmem:[%s1926_s0] sm:$0xff]  ;;  %v1488_v12 = vld [vmem:[%s1924_s2 + $0x48] sm:$0xff] }
   0x5   :  { %1061 = vmatprep.subr.mxu1 %v1390_v0  ;;  %1039 = vmatprep.subr.mxu0 %v33_v5  ;;  %v24_v13 = vld [vmem:[%s1926_s0 + $0x8] sm:$0xff]  ;;  %v1498_v14 = vld [vmem:[%s1924_s2 + $0x40] sm:$0xff]  ;;  %v1507_v15 = vld [vmem:[%s1924_s2 + $0x38] sm:$0xff] }
   0x6   :  { %1062 = vmatpush3.msra.mxu1 %v1445_v3  ;;  %1040 = vmatpush3.msra.mxu0 %v33_v5  ;;  %v1516_v16 = vld [vmem:[%s1924_s2 + $0x30] sm:$0xff]  ;;  %v1525_v17 = vld [vmem:[%s1924_s2 + $0x28] sm:$0xff]  ;;  %v1534_v18 = vld [vmem:[%s1924_s2 + $0x20] sm:$0xff] }
   0x7   :  { %1063 = vmatprep.subr.mxu1 %v1390_v0  ;;  %1041 = vmatprep.subr.mxu0 %v32_v7  ;;  %v1543_v19 = vld [vmem:[%s1924_s2 + $0x18] sm:$0xff]  ;;  %v1552_v20 = vld [vmem:[%s1924_s2 + $0x10] sm:$0xff]  ;;  %v1561_v21 = vld [vmem:[%s1924_s2 + $0x8] sm:$0xff] }
   0x8   :  { %1064 = vmatpush3.msra.mxu1 %v1458_v6  ;;  %1042 = vmatpush3.msra.mxu0 %v32_v7  ;;  %v1570_v22 = vld [vmem:[%s1924_s2] sm:$0xff]  ;;  %v25_v23 = vld [vmem:[%s1926_s0 + $0x10] sm:$0xff]  ;;  %v26_v24 = vld [vmem:[%s1926_s0 + $0x18] sm:$0xff] }
   0x9   :  { %1065 = vmatprep.subr.mxu1 %v1390_v0  ;;  %1043 = vmatprep.subr.mxu0 %v31_v9  ;;  %v27_v25 = vld [vmem:[%s1926_s0 + $0x20] sm:$0xff]  ;;  %v28_v26 = vld [vmem:[%s1926_s0 + $0x28] sm:$0xff]  ;;  %v29_v27 = vld [vmem:[%s1926_s0 + $0x30] sm:$0xff] }
   0xa   :  { %1066 = vmatpush3.msra.mxu1 %v1468_v8  ;;  %1044 = vmatpush3.msra.mxu0 %v31_v9  ;;  %v30_v28 = vld [vmem:[%s1926_s0 + $0x38] sm:$0xff]  ;;  %v1659_v30 = vld [vmem:[%s1927_s3] ss:$0 sm:$0xff]  ;;  %v777_v7 = vld [vmem:[%s1928_s4 + $0x68] sm:$0xff] }
   0xb   :  { %1067 = vmatprep.subr.mxu1 %v1390_v0  ;;  %1045 = vmatprep.mubr.msk.f32.mxu0 %vm42_vm1, %v23_v11  ;;  %v779_v5 = vld [vmem:[%s1928_s4 + $0x78] sm:$0xff]  ;;  %v773_v11 = vld [vmem:[%s1928_s4 + $0x48] sm:$0xff] }
   0xc   :  { %1068 = vmatpush3.msra.mxu1 %v1478_v10  ;;  %1046 = vmatmul.mubr.msk.f32.vlgmr.msra.gmra.mxu0 %vm42_vm1, %v24_v13  ;;  %v775_v9 = vld [vmem:[%s1928_s4 + $0x58] sm:$0xff] }
   0xd   :  { %1069 = vmatprep.subr.mxu1 %v1390_v0  ;;  %1092 = vmatprep.subr.mxu0 %v1390_v0 }
   0xe   :  { %1070 = vmatpush3.msra.mxu1 %v1488_v12  ;;  %1093 = vmatpush3.msra.mxu0 %v1431_v1 }
   0xf   :  { %1071 = vmatprep.subr.mxu1 %v1390_v0  ;;  %1094 = vmatprep.subr.mxu0 %v1390_v0 }
  0x10   :  { %1072 = vmatpush3.msra.mxu1 %v1498_v14  ;;  %1095 = vmatpush3.msra.mxu0 %v1436_v2 }
  0x11   :  { %1073 = vmatprep.subr.mxu1 %v1390_v0  ;;  %1096 = vmatprep.subr.mxu0 %v1390_v0 }
  0x12   :  { %1074 = vmatpush3.msra.mxu1 %v1507_v15  ;;  %1097 = vmatpush3.msra.mxu0 %v1445_v3 }
  0x13   :  { %1075 = vmatprep.subr.mxu1 %v1390_v0  ;;  %1098 = vmatprep.subr.mxu0 %v1390_v0 }
  0x14   :  { %1076 = vmatpush3.msra.mxu1 %v1516_v16  ;;  %1099 = vmatpush3.msra.mxu0 %v1458_v6 }
  0x15   :  { %1077 = vmatprep.subr.mxu1 %v1390_v0  ;;  %1100 = vmatprep.subr.mxu0 %v1390_v0 }
  0x16   :  { %1078 = vmatpush3.msra.mxu1 %v1525_v17  ;;  %1101 = vmatpush3.msra.mxu0 %v1468_v8 }
  0x17   :  { %1079 = vmatprep.subr.mxu1 %v1390_v0  ;;  %1102 = vmatprep.subr.mxu0 %v1390_v0 }
  0x18   :  { %1080 = vmatpush3.msra.mxu1 %v1534_v18  ;;  %1103 = vmatpush3.msra.mxu0 %v1478_v10 }
  0x19   :  { %1081 = vmatprep.subr.mxu1 %v1390_v0  ;;  %1104 = vmatprep.subr.mxu0 %v1390_v0 }
  0x1a   :  { %1082 = vmatpush3.msra.mxu1 %v1543_v19  ;;  %1105 = vmatpush3.msra.mxu0 %v1488_v12 }
  0x1b   :  { %1083 = vmatprep.subr.mxu1 %v1390_v0  ;;  %1106 = vmatprep.subr.mxu0 %v1390_v0 }
  0x1c   :  { %1084 = vmatpush3.msra.mxu1 %v1552_v20  ;;  %1107 = vmatpush3.msra.mxu0 %v1498_v14 }
  0x1d   :  { %1085 = vmatprep.subr.mxu1 %v1390_v0  ;;  %1108 = vmatprep.subr.mxu0 %v1390_v0 }
  0x1e   :  { %1086 = vmatpush3.msra.mxu1 %v1561_v21  ;;  %1109 = vmatpush3.msra.mxu0 %v1507_v15 }
  0x1f   :  { %1087 = vmatprep.subr.mxu1 %v1390_v0  ;;  %1110 = vmatprep.subr.mxu0 %v1390_v0 }
  0x20   :  { %1088 = vmatpush3.msra.mxu1 %v1570_v22  ;;  %1111 = vmatpush3.msra.mxu0 %v1516_v16 }
  0x21   :  { %1090 = vmatmul.mubr.f32.vlgmr.msra.gmra.mxu1 %v1390_v0  ;;  %1127 = vmatprep.subr.mxu1 %v1390_v0 }
  0x22   :  { %1112 = vmatprep.subr.mxu0 %v1390_v0  ;;  %1128 = vmatpush3.msra.mxu1 %v1431_v1 }
  0x23   :  { %1113 = vmatpush3.msra.mxu0 %v1525_v17  ;;  %1129 = vmatprep.subr.mxu1 %v1390_v0 }
  0x24   :  { %1114 = vmatprep.subr.mxu0 %v1390_v0  ;;  %1130 = vmatpush3.msra.mxu1 %v1436_v2 }
  0x25   :  { %1115 = vmatpush3.msra.mxu0 %v1534_v18  ;;  %1131 = vmatprep.subr.mxu1 %v1390_v0 }
  0x26   :  { %1116 = vmatprep.subr.mxu0 %v1390_v0  ;;  %1132 = vmatpush3.msra.mxu1 %v1445_v3 }
  0x27   :  { %1117 = vmatpush3.msra.mxu0 %v1543_v19  ;;  %1133 = vmatprep.subr.mxu1 %v1390_v0 }
  0x28   :  { %1118 = vmatprep.subr.mxu0 %v1390_v0  ;;  %1134 = vmatpush3.msra.mxu1 %v1458_v6 }
  0x29   :  { %1119 = vmatpush3.msra.mxu0 %v1552_v20  ;;  %1135 = vmatprep.subr.mxu1 %v1390_v0 }
  0x2a   :  { %1120 = vmatprep.subr.mxu0 %v1390_v0  ;;  %1136 = vmatpush3.msra.mxu1 %v1468_v8 }
  0x2b   :  { %1121 = vmatpush3.msra.mxu0 %v1561_v21  ;;  %1137 = vmatprep.subr.mxu1 %v1390_v0 }
  0x2c   :  { %1122 = vmatprep.subr.mxu0 %v1390_v0  ;;  %1138 = vmatpush3.msra.mxu1 %v1478_v10 }
  0x2d   :  { %1123 = vmatpush3.msra.mxu0 %v1570_v22  ;;  %1139 = vmatprep.subr.mxu1 %v1390_v0 }
  0x2e   :  { %1140 = vmatpush3.msra.mxu1 %v1488_v12  ;;  %1159 = vmatprep.mubr.msk.f32.mxu1 %vm1391_vm0, %v1390_v0 }
  0x2f   :  { %1141 = vmatprep.subr.mxu1 %v1390_v0  ;;  %1162 = vmatprep.subr.mxu0 %v1390_v0 }
  0x30   :  { %1142 = vmatpush3.msra.mxu1 %v1498_v14  ;;  %1048 = vmatprep.mubr.msk.f32.mxu0 %vm42_vm1, %v25_v23  ;;  %v766_v23 = vld [vmem:[%s1928_s4 + $0x10] sm:$0xff] }
  0x31   :  { %1143 = vmatprep.subr.mxu1 %v1390_v0  ;;  %1049 = vmatmul.mubr.msk.f32.gmra.mxu0 %vm42_vm1, %v26_v24  ;;  %v765_v24 = vld [vmem:[%s1928_s4 + $0x8] sm:$0xff] }
  0x32   :  { %1144 = vmatpush3.msra.mxu1 %v1507_v15  ;;  %1051 = vmatprep.mubr.msk.f32.mxu0 %vm42_vm1, %v27_v25  ;;  %v764_v25 = vld [vmem:[%s1928_s4] sm:$0xff] }
  0x33   :  { %1145 = vmatprep.subr.mxu1 %v1390_v0 }
  0x34   :  { %1146 = vmatpush3.msra.mxu1 %v1516_v16 }
  0x35   :  { %1147 = vmatprep.subr.mxu1 %v1390_v0  ;;  %1052 = vmatmul.mubr.msk.f32.gmra.mxu0 %vm42_vm1, %v28_v26 }
  0x36   :  { %1148 = vmatpush3.msra.mxu1 %v1525_v17  ;;  %1054 = vmatprep.mubr.msk.f32.mxu0 %vm42_vm1, %v29_v27 }
  0x37   :  { %1149 = vmatprep.subr.mxu1 %v1390_v0 }
  0x38   :  { %1150 = vmatpush3.msra.mxu1 %v1534_v18 }
  0x39   :  { %1151 = vmatprep.subr.mxu1 %v1390_v0  ;;  %1055 = vmatmul.mubr.msk.f32.gmra.mxu0 %vm42_vm1, %v30_v28 }
  0x3a   :  { %1152 = vmatpush3.msra.mxu1 %v1543_v19  ;;  %1124 = vmatprep.mubr.msk.f32.mxu0 %vm1391_vm0, %v1390_v0 }
  0x3b   :  { %1153 = vmatprep.subr.mxu1 %v1390_v0 }
  0x3c   :  { %1154 = vmatpush3.msra.mxu1 %v1552_v20 }
  0x3d   :  { %1155 = vmatprep.subr.mxu1 %v1390_v0 }
  0x3e   :  { %1156 = vmatpush3.msra.mxu1 %v1561_v21 }
  0x3f   :  { %1157 = vmatprep.subr.mxu1 %v1390_v0 }
  0x40   :  { %1158 = vmatpush3.msra.mxu1 %v1570_v22 }
  0x41   :  { %1197 = vmatprep.subr.mxu1 %v1390_v0 }
  0xcc   :  { %v1047_v29 = vpop.f32.mrf.mxu0 }
  0xcd   :  { %v139_v43 = vadd.f32 %v1047_v29, %v1659_v30 }
  0xce   :  { %v133_v31 = vpop.f32.mrf.mxu0 }
  0xcf   :  { %v134_v32 = vadd.f32 %v1659_v30, %v133_v31 }
  0xe1   :  { %v254_v33 = vpop.f32.mrf.mxu1 }
  0xe2   :  { %v258_v34 = vadd.f32 %v254_v33, %v134_v32  ;;  %v871_v32 = vld [vmem:[%s1929_s5] ss:$0 sm:$0xff] }
  0xe3   :  { %v1091_v35 = vpop.f32.mrf.mxu1 }
  0xe4   :  { %1374 = vtanh.f32 %v258_v34 }
  0xf1   :  { %v1375_v36 = vpop.eup %1374  ;;  %v1696_v37 = vpop.f32.mrf.mxu0 }
  0xf2   :  { %1125 = vmatmul.mubr.f32.vlgmr.msra.gmra.mxu0 %v1375_v36  ;;  %v149_v53 = vadd.f32 %v1696_v37, %v1659_v30 }
  0xf3   :  { %1163 = vmatpush3.msra.mxu0 %v1431_v1  ;;  %1194 = vmatprep.mubr.msk.f32.mxu0 %vm1391_vm0, %v1390_v0  ;;  %v143_v38 = vpop.f32.mrf.mxu0 }
  0xf4   :  { %1164 = vmatprep.subr.mxu0 %v1390_v0  ;;  %v144_v48 = vadd.f32 %v1659_v30, %v143_v38 }
  0xf5   :  { %1165 = vmatpush3.msra.mxu0 %v1436_v2  ;;  %v1698_v39 = vpop.f32.mrf.mxu0 }
  0xf6   :  { %1166 = vmatprep.subr.mxu0 %v1390_v0  ;;  %v159_v63 = vadd.f32 %v1698_v39, %v1659_v30 }
  0xf7   :  { %1167 = vmatpush3.msra.mxu0 %v1445_v3  ;;  %v1700_v40 = vpop.f32.mrf.mxu0 }
  0xf8   :  { %1168 = vmatprep.subr.mxu0 %v1390_v0  ;;  %v154_v58 = vadd.f32 %v1659_v30, %v1700_v40 }
  0xf9   :  { %1169 = vmatpush3.msra.mxu0 %v1458_v6  ;;  %v1702_v41 = vpop.f32.mrf.mxu0 }
  0xfa   :  { %1170 = vmatprep.subr.mxu0 %v1390_v0  ;;  %v169_v26 = vadd.f32 %v1702_v41, %v1659_v30 }
  0xfb   :  { %1171 = vmatpush3.msra.mxu0 %v1468_v8  ;;  %v1704_v42 = vpop.f32.mrf.mxu0 }
  0xfc   :  { %1172 = vmatprep.subr.mxu0 %v1390_v0 }
  0xfd   :  { %1173 = vmatpush3.msra.mxu0 %v1478_v10 }
  0xfe   :  { %1174 = vmatprep.subr.mxu0 %v1390_v0 }
  0xff   :  { %1175 = vmatpush3.msra.mxu0 %v1488_v12 }
 0x100   :  { %1176 = vmatprep.subr.mxu0 %v1390_v0 }
 0x101   :  { %1177 = vmatpush3.msra.mxu0 %v1498_v14 }
 0x102   :  { %1178 = vmatprep.subr.mxu0 %v1390_v0 }
 0x103   :  { %1179 = vmatpush3.msra.mxu0 %v1507_v15 }
 0x104   :  { %1180 = vmatprep.subr.mxu0 %v1390_v0 }
 0x105   :  { %1181 = vmatpush3.msra.mxu0 %v1516_v16 }
 0x106   :  { %1182 = vmatprep.subr.mxu0 %v1390_v0 }
 0x107   :  { %1183 = vmatpush3.msra.mxu0 %v1525_v17 }
 0x108   :  { %1184 = vmatprep.subr.mxu0 %v1390_v0 }
 0x109   :  { %1185 = vmatpush3.msra.mxu0 %v1534_v18 }
 0x10a   :  { %1186 = vmatprep.subr.mxu0 %v1390_v0 }
 0x10b   :  { %1187 = vmatpush3.msra.mxu0 %v1543_v19 }
 0x10c   :  { %1188 = vmatprep.subr.mxu0 %v1390_v0 }
 0x10d   :  { %1189 = vmatpush3.msra.mxu0 %v1552_v20 }
 0x10e   :  { %1190 = vmatprep.subr.mxu0 %v1390_v0 }
 0x10f   :  { %1191 = vmatpush3.msra.mxu0 %v1561_v21 }
 0x110   :  { %1192 = vmatprep.subr.mxu0 %v1390_v0 }
 0x111   :  { %1193 = vmatpush3.msra.mxu0 %v1570_v22 }
 0x112   :  { %1232 = vmatprep.subr.mxu0 %v1390_v0 }
 0x1b2   :  { %v326_v44 = vpop.f32.mrf.mxu0 }
 0x1b3   :  { %v330_v45 = vadd.f32 %v326_v44, %v139_v43 }
 0x1b4   :  { %v1126_v46 = vpop.f32.mrf.mxu0 }
 0x1b5   :  { %1376 = vtanh.f32 %v330_v45 }
 0x1c2   :  { %v1377_v47 = vpop.eup %1376 }
 0x1c3   :  { %1160 = vmatmul.mubr.f32.vlgmr.msra.gmra.mxu1 %v1377_v47 }
 0x1c4   :  { %1198 = vmatpush3.msra.mxu1 %v1431_v1  ;;  %1229 = vmatprep.mubr.msk.f32.mxu1 %vm1391_vm0, %v1390_v0 }
 0x1c5   :  { %1199 = vmatprep.subr.mxu1 %v1390_v0 }
 0x1c6   :  { %1200 = vmatpush3.msra.mxu1 %v1436_v2 }
 0x1c7   :  { %1201 = vmatprep.subr.mxu1 %v1390_v0 }
 0x1c8   :  { %1202 = vmatpush3.msra.mxu1 %v1445_v3 }
 0x1c9   :  { %1203 = vmatprep.subr.mxu1 %v1390_v0 }
 0x1ca   :  { %1204 = vmatpush3.msra.mxu1 %v1458_v6 }
 0x1cb   :  { %1205 = vmatprep.subr.mxu1 %v1390_v0 }
 0x1cc   :  { %1206 = vmatpush3.msra.mxu1 %v1468_v8 }
 0x1cd   :  { %1207 = vmatprep.subr.mxu1 %v1390_v0 }
 0x1ce   :  { %1208 = vmatpush3.msra.mxu1 %v1478_v10 }
 0x1cf   :  { %1209 = vmatprep.subr.mxu1 %v1390_v0 }
 0x1d0   :  { %1210 = vmatpush3.msra.mxu1 %v1488_v12 }
 0x1d1   :  { %1211 = vmatprep.subr.mxu1 %v1390_v0 }
 0x1d2   :  { %1212 = vmatpush3.msra.mxu1 %v1498_v14 }
 0x1d3   :  { %1213 = vmatprep.subr.mxu1 %v1390_v0 }
 0x1d4   :  { %1214 = vmatpush3.msra.mxu1 %v1507_v15 }
 0x1d5   :  { %1215 = vmatprep.subr.mxu1 %v1390_v0 }
 0x1d6   :  { %1216 = vmatpush3.msra.mxu1 %v1516_v16 }
 0x1d7   :  { %1217 = vmatprep.subr.mxu1 %v1390_v0 }
 0x1d8   :  { %1218 = vmatpush3.msra.mxu1 %v1525_v17 }
 0x1d9   :  { %1219 = vmatprep.subr.mxu1 %v1390_v0 }
 0x1da   :  { %1220 = vmatpush3.msra.mxu1 %v1534_v18 }
 0x1db   :  { %1221 = vmatprep.subr.mxu1 %v1390_v0 }
 0x1dc   :  { %1222 = vmatpush3.msra.mxu1 %v1543_v19 }
 0x1dd   :  { %1223 = vmatprep.subr.mxu1 %v1390_v0 }
 0x1de   :  { %1224 = vmatpush3.msra.mxu1 %v1552_v20 }
 0x1df   :  { %1225 = vmatprep.subr.mxu1 %v1390_v0 }
 0x1e0   :  { %1226 = vmatpush3.msra.mxu1 %v1561_v21 }
 0x1e1   :  { %1227 = vmatprep.subr.mxu1 %v1390_v0 }
 0x1e2   :  { %1228 = vmatpush3.msra.mxu1 %v1570_v22 }
 0x1e3   :  { %1267 = vmatprep.subr.mxu1 %v1390_v0 }
 0x283   :  { %v398_v49 = vpop.f32.mrf.mxu1 }
 0x284   :  { %v402_v50 = vadd.f32 %v398_v49, %v144_v48 }
 0x285   :  { %v1161_v51 = vpop.f32.mrf.mxu1 }
 0x286   :  { %1378 = vtanh.f32 %v402_v50 }
 0x293   :  { %v1379_v52 = vpop.eup %1378 }
 0x294   :  { %1195 = vmatmul.mubr.f32.vlgmr.msra.gmra.mxu0 %v1379_v52 }
 0x295   :  { %1233 = vmatpush3.msra.mxu0 %v1431_v1  ;;  %1264 = vmatprep.mubr.msk.f32.mxu0 %vm1391_vm0, %v1390_v0 }
 0x296   :  { %1234 = vmatprep.subr.mxu0 %v1390_v0 }
 0x297   :  { %1235 = vmatpush3.msra.mxu0 %v1436_v2 }
 0x298   :  { %1236 = vmatprep.subr.mxu0 %v1390_v0 }
 0x299   :  { %1237 = vmatpush3.msra.mxu0 %v1445_v3 }
 0x29a   :  { %1238 = vmatprep.subr.mxu0 %v1390_v0 }
 0x29b   :  { %1239 = vmatpush3.msra.mxu0 %v1458_v6 }
 0x29c   :  { %1240 = vmatprep.subr.mxu0 %v1390_v0 }
 0x29d   :  { %1241 = vmatpush3.msra.mxu0 %v1468_v8 }
 0x29e   :  { %1242 = vmatprep.subr.mxu0 %v1390_v0 }
 0x29f   :  { %1243 = vmatpush3.msra.mxu0 %v1478_v10 }
 0x2a0   :  { %1244 = vmatprep.subr.mxu0 %v1390_v0 }
 0x2a1   :  { %1245 = vmatpush3.msra.mxu0 %v1488_v12 }
 0x2a2   :  { %1246 = vmatprep.subr.mxu0 %v1390_v0 }
 0x2a3   :  { %1247 = vmatpush3.msra.mxu0 %v1498_v14 }
 0x2a4   :  { %1248 = vmatprep.subr.mxu0 %v1390_v0 }
 0x2a5   :  { %1249 = vmatpush3.msra.mxu0 %v1507_v15 }
 0x2a6   :  { %1250 = vmatprep.subr.mxu0 %v1390_v0 }
 0x2a7   :  { %1251 = vmatpush3.msra.mxu0 %v1516_v16 }
 0x2a8   :  { %1252 = vmatprep.subr.mxu0 %v1390_v0 }
 0x2a9   :  { %1253 = vmatpush3.msra.mxu0 %v1525_v17 }
 0x2aa   :  { %1254 = vmatprep.subr.mxu0 %v1390_v0 }
 0x2ab   :  { %1255 = vmatpush3.msra.mxu0 %v1534_v18 }
 0x2ac   :  { %1256 = vmatprep.subr.mxu0 %v1390_v0 }
 0x2ad   :  { %1257 = vmatpush3.msra.mxu0 %v1543_v19 }
 0x2ae   :  { %1258 = vmatprep.subr.mxu0 %v1390_v0 }
 0x2af   :  { %1259 = vmatpush3.msra.mxu0 %v1552_v20 }
 0x2b0   :  { %1260 = vmatprep.subr.mxu0 %v1390_v0 }
 0x2b1   :  { %1261 = vmatpush3.msra.mxu0 %v1561_v21 }
 0x2b2   :  { %1262 = vmatprep.subr.mxu0 %v1390_v0 }
 0x2b3   :  { %1263 = vmatpush3.msra.mxu0 %v1570_v22 }
 0x2b4   :  { %1302 = vmatprep.subr.mxu0 %v1390_v0 }
 0x354   :  { %v470_v54 = vpop.f32.mrf.mxu0 }
 0x355   :  { %v474_v55 = vadd.f32 %v470_v54, %v149_v53 }
 0x356   :  { %v1196_v56 = vpop.f32.mrf.mxu0 }
 0x357   :  { %1380 = vtanh.f32 %v474_v55 }
 0x364   :  { %v1381_v57 = vpop.eup %1380 }
 0x365   :  { %1230 = vmatmul.mubr.f32.vlgmr.msra.gmra.mxu1 %v1381_v57 }
 0x366   :  { %1268 = vmatpush3.msra.mxu1 %v1431_v1  ;;  %1299 = vmatprep.mubr.msk.f32.mxu1 %vm1391_vm0, %v1390_v0 }
 0x367   :  { %1269 = vmatprep.subr.mxu1 %v1390_v0 }
 0x368   :  { %1270 = vmatpush3.msra.mxu1 %v1436_v2 }
 0x369   :  { %1271 = vmatprep.subr.mxu1 %v1390_v0 }
 0x36a   :  { %1272 = vmatpush3.msra.mxu1 %v1445_v3 }
 0x36b   :  { %1273 = vmatprep.subr.mxu1 %v1390_v0 }
 0x36c   :  { %1274 = vmatpush3.msra.mxu1 %v1458_v6 }
 0x36d   :  { %1275 = vmatprep.subr.mxu1 %v1390_v0 }
 0x36e   :  { %1276 = vmatpush3.msra.mxu1 %v1468_v8 }
 0x36f   :  { %1277 = vmatprep.subr.mxu1 %v1390_v0 }
 0x370   :  { %1278 = vmatpush3.msra.mxu1 %v1478_v10 }
 0x371   :  { %1279 = vmatprep.subr.mxu1 %v1390_v0 }
 0x372   :  { %1280 = vmatpush3.msra.mxu1 %v1488_v12 }
 0x373   :  { %1281 = vmatprep.subr.mxu1 %v1390_v0 }
 0x374   :  { %1282 = vmatpush3.msra.mxu1 %v1498_v14 }
 0x375   :  { %1283 = vmatprep.subr.mxu1 %v1390_v0 }
 0x376   :  { %1284 = vmatpush3.msra.mxu1 %v1507_v15 }
 0x377   :  { %1285 = vmatprep.subr.mxu1 %v1390_v0 }
 0x378   :  { %1286 = vmatpush3.msra.mxu1 %v1516_v16 }
 0x379   :  { %1287 = vmatprep.subr.mxu1 %v1390_v0 }
 0x37a   :  { %1288 = vmatpush3.msra.mxu1 %v1525_v17 }
 0x37b   :  { %1289 = vmatprep.subr.mxu1 %v1390_v0 }
 0x37c   :  { %1290 = vmatpush3.msra.mxu1 %v1534_v18 }
 0x37d   :  { %1291 = vmatprep.subr.mxu1 %v1390_v0 }
 0x37e   :  { %1292 = vmatpush3.msra.mxu1 %v1543_v19 }
 0x37f   :  { %1293 = vmatprep.subr.mxu1 %v1390_v0 }
 0x380   :  { %1294 = vmatpush3.msra.mxu1 %v1552_v20 }
 0x381   :  { %1295 = vmatprep.subr.mxu1 %v1390_v0 }
 0x382   :  { %1296 = vmatpush3.msra.mxu1 %v1561_v21 }
 0x383   :  { %1297 = vmatprep.subr.mxu1 %v1390_v0 }
 0x384   :  { %1298 = vmatpush3.msra.mxu1 %v1570_v22 }
 0x385   :  { %1337 = vmatprep.subr.mxu1 %v1390_v0 }
 0x425   :  { %v542_v59 = vpop.f32.mrf.mxu1 }
 0x426   :  { %v546_v60 = vadd.f32 %v542_v59, %v154_v58 }
 0x427   :  { %v1231_v61 = vpop.f32.mrf.mxu1 }
 0x428   :  { %1382 = vtanh.f32 %v546_v60 }
 0x435   :  { %v1383_v62 = vpop.eup %1382 }
 0x436   :  { %1265 = vmatmul.mubr.f32.vlgmr.msra.gmra.mxu0 %v1383_v62 }
 0x437   :  { %1303 = vmatpush3.msra.mxu0 %v1431_v1  ;;  %1334 = vmatprep.mubr.msk.f32.mxu0 %vm1391_vm0, %v1390_v0 }
 0x438   :  { %1304 = vmatprep.subr.mxu0 %v1390_v0 }
 0x439   :  { %1305 = vmatpush3.msra.mxu0 %v1436_v2 }
 0x43a   :  { %1306 = vmatprep.subr.mxu0 %v1390_v0 }
 0x43b   :  { %1307 = vmatpush3.msra.mxu0 %v1445_v3 }
 0x43c   :  { %1308 = vmatprep.subr.mxu0 %v1390_v0 }
 0x43d   :  { %1309 = vmatpush3.msra.mxu0 %v1458_v6  ;;  %v778_v6 = vld [vmem:[%s1928_s4 + $0x70] sm:$0xff] }
 0x43e   :  { %1310 = vmatprep.subr.mxu0 %v1390_v0 }
 0x43f   :  { %1311 = vmatpush3.msra.mxu0 %v1468_v8  ;;  %v776_v8 = vld [vmem:[%s1928_s4 + $0x60] sm:$0xff] }
 0x440   :  { %1312 = vmatprep.subr.mxu0 %v1390_v0 }
 0x441   :  { %1313 = vmatpush3.msra.mxu0 %v1478_v10  ;;  %v774_v10 = vld [vmem:[%s1928_s4 + $0x50] sm:$0xff] }
 0x442   :  { %1314 = vmatprep.subr.mxu0 %v1390_v0 }
 0x443   :  { %1315 = vmatpush3.msra.mxu0 %v1488_v12  ;;  %v164_v12 = vadd.f32 %v1659_v30, %v1704_v42 }
 0x444   :  { %1316 = vmatprep.subr.mxu0 %v1390_v0 }
 0x445   :  { %1317 = vmatpush3.msra.mxu0 %v1498_v14 }
 0x446   :  { %1318 = vmatprep.subr.mxu0 %v1390_v0 }
 0x447   :  { %1319 = vmatpush3.msra.mxu0 %v1507_v15 }
 0x448   :  { %1320 = vmatprep.subr.mxu0 %v1390_v0 }
 0x449   :  { %1321 = vmatpush3.msra.mxu0 %v1516_v16 }
 0x44a   :  { %1322 = vmatprep.subr.mxu0 %v1390_v0 }
 0x44b   :  { %1323 = vmatpush3.msra.mxu0 %v1525_v17  ;;  %v772_v17 = vld [vmem:[%s1928_s4 + $0x40] sm:$0xff] }
 0x44c   :  { %1324 = vmatprep.subr.mxu0 %v1390_v0 }
 0x44d   :  { %1325 = vmatpush3.msra.mxu0 %v1534_v18  ;;  %v771_v18 = vld [vmem:[%s1928_s4 + $0x38] sm:$0xff] }
 0x44e   :  { %1326 = vmatprep.subr.mxu0 %v1390_v0 }
 0x44f   :  { %1327 = vmatpush3.msra.mxu0 %v1543_v19  ;;  %v770_v19 = vld [vmem:[%s1928_s4 + $0x30] sm:$0xff] }
 0x450   :  { %1328 = vmatprep.subr.mxu0 %v1390_v0 }
 0x451   :  { %1329 = vmatpush3.msra.mxu0 %v1552_v20  ;;  %v769_v20 = vld [vmem:[%s1928_s4 + $0x28] sm:$0xff] }
 0x452   :  { %1330 = vmatprep.subr.mxu0 %v1390_v0 }
 0x453   :  { %1331 = vmatpush3.msra.mxu0 %v1561_v21  ;;  %v768_v21 = vld [vmem:[%s1928_s4 + $0x20] sm:$0xff] }
 0x454   :  { %1332 = vmatprep.subr.mxu0 %v1390_v0 }
 0x455   :  { %1333 = vmatpush3.msra.mxu0 %v1570_v22  ;;  %v767_v22 = vld [vmem:[%s1928_s4 + $0x18] sm:$0xff] }
 0x4f6   :  { %v614_v1 = vpop.f32.mrf.mxu0 }
 0x4f7   :  { %v618_v2 = vadd.f32 %v614_v1, %v159_v63 }
 0x4f8   :  { %v1266_v3 = vpop.f32.mrf.mxu0 }
 0x4f9   :  { %1384 = vtanh.f32 %v618_v2 }
 0x506   :  { %v1385_v4 = vpop.eup %1384 }
 0x507   :  { %1300 = vmatmul.mubr.f32.vlgmr.msra.gmra.mxu1 %v1385_v4 }
 0x508   :  { %1369 = vmatprep.mubr.msk.f32.mxu1 %vm1391_vm0, %v1390_v0  ;;  %1338 = vmatpush3.msra.mxu1 %v779_v5 }
 0x509   :  { %1339 = vmatprep.subr.mxu1 %v1390_v0 }
 0x50a   :  { %1340 = vmatpush3.msra.mxu1 %v778_v6 }
 0x50b   :  { %1341 = vmatprep.subr.mxu1 %v1390_v0 }
 0x50c   :  { %1342 = vmatpush3.msra.mxu1 %v777_v7 }
 0x50d   :  { %1343 = vmatprep.subr.mxu1 %v1390_v0 }
 0x50e   :  { %1344 = vmatpush3.msra.mxu1 %v776_v8 }
 0x50f   :  { %1345 = vmatprep.subr.mxu1 %v1390_v0 }
 0x510   :  { %1346 = vmatpush3.msra.mxu1 %v775_v9 }
 0x511   :  { %1347 = vmatprep.subr.mxu1 %v1390_v0 }
 0x512   :  { %1348 = vmatpush3.msra.mxu1 %v774_v10 }
 0x513   :  { %1349 = vmatprep.subr.mxu1 %v1390_v0 }
 0x514   :  { %1350 = vmatpush3.msra.mxu1 %v773_v11 }
 0x515   :  { %1351 = vmatprep.subr.mxu1 %v1390_v0 }
 0x516   :  { %1352 = vmatpush3.msra.mxu1 %v772_v17 }
 0x517   :  { %1353 = vmatprep.subr.mxu1 %v1390_v0 }
 0x518   :  { %1354 = vmatpush3.msra.mxu1 %v771_v18 }
 0x519   :  { %1355 = vmatprep.subr.mxu1 %v1390_v0 }
 0x51a   :  { %1356 = vmatpush3.msra.mxu1 %v770_v19 }
 0x51b   :  { %1357 = vmatprep.subr.mxu1 %v1390_v0 }
 0x51c   :  { %1358 = vmatpush3.msra.mxu1 %v769_v20 }
 0x51d   :  { %1359 = vmatprep.subr.mxu1 %v1390_v0 }
 0x51e   :  { %1360 = vmatpush3.msra.mxu1 %v768_v21 }
 0x51f   :  { %1361 = vmatprep.subr.mxu1 %v1390_v0 }
 0x520   :  { %1362 = vmatpush3.msra.mxu1 %v767_v22 }
 0x521   :  { %1363 = vmatprep.subr.mxu1 %v1390_v0 }
 0x522   :  { %1364 = vmatpush3.msra.mxu1 %v766_v23 }
 0x523   :  { %1365 = vmatprep.subr.mxu1 %v1390_v0 }
 0x524   :  { %1366 = vmatpush3.msra.mxu1 %v765_v24 }
 0x525   :  { %1367 = vmatprep.subr.mxu1 %v1390_v0 }
 0x526   :  { %1368 = vmatpush3.msra.mxu1 %v764_v25 }
 0x5c7   :  { %v686_v13 = vpop.f32.mrf.mxu1 }
 0x5c8   :  { %v690_v14 = vadd.f32 %v686_v13, %v164_v12 }
 0x5c9   :  { %v1301_v15 = vpop.f32.mrf.mxu1 }
 0x5ca   :  { %1386 = vtanh.f32 %v690_v14 }
 0x5d7   :  { %v1387_v16 = vpop.eup %1386 }
 0x5d8   :  { %1335 = vmatmul.mubr.f32.vlgmr.msra.gmra.mxu0 %v1387_v16 }
 0x698   :  { %v758_v27 = vpop.f32.mrf.mxu0 }
 0x699   :  { %v762_v28 = vadd.f32 %v758_v27, %v169_v26 }
 0x69a   :  { %v1336_v29 = vpop.f32.mrf.mxu0 }
 0x69b   :  { %1388 = vtanh.f32 %v762_v28 }
 0x6a8   :  { %v1389_v31 = vpop.eup %1388 }
 0x6a9   :  { %1370 = vmatmul.mubr.f32.vlgmr.msra.gmra.mxu1 %v1389_v31 }
 0x769   :  { %v853_v33 = vpop.f32.mrf.mxu1 }
 0x76a   :  { %v854_v34 = vadd.f32 %v871_v32, %v853_v33 }
 0x76b   :  { %v1371_v35 = vpop.f32.mrf.mxu1 }
 0x76c   :  { %857 = vst [vmem:[%s1930_s6] sm:$0xff] %v854_v34 }

</bundles_post_ra>
